<compile_context>
chip_gen: v6e
topology: v6e:2x2x1
jax: 0.10.0
libtpu: 0.0.40
codegen_flags: <defaults>
</compile_context>

<pallas_src>
import functools
import math

import jax
import jax.numpy as jnp
from jax.experimental import pallas as pl
from jax.experimental.pallas import tpu as pltpu


def _round_up(x, m):
    return ((x + m - 1) // m) * m


def _cdiv(a, b):
    return (a + b - 1) // b


# ------------------------------- Pallas kernel ------------------------------ #

def _make_kernel(*, training: bool, single_k: bool):
    """relu(dropout(x @ w + b)) over a (M_tiles, N_tiles, K_tiles) grid.

    K (reduction) is the innermost / "arbitrary" grid axis.  The f32 output
    block is the accumulator (its index map ignores k, so it stays resident in
    VMEM across the K loop); bias + dropout-mask + ReLU are fused into the
    last-K epilogue.  pl.program_id is only queried at the kernel top level.
    """

    def _epilogue(acc, b_ref, m_ref):
        y = acc + b_ref[...]                       # f32 bias add on the VPU
        if training:
            y = y * m_ref[...]                     # keep-mask, pre-scaled by 1/(1-p)
        return jnp.maximum(y, 0.0)                 # ReLU

    def _body(x_ref, w_ref, b_ref, m_ref, o_ref):
        if single_k:
            acc = jnp.dot(x_ref[...], w_ref[...],
                          preferred_element_type=jnp.float32)
            o_ref[...] = _epilogue(acc, b_ref, m_ref).astype(o_ref.dtype)
            return

        k = pl.program_id(2)
        last_k = pl.num_programs(2) - 1

        @pl.when(k == 0)
        def _():
            o_ref[...] = jnp.zeros_like(o_ref)

        o_ref[...] += jnp.dot(x_ref[...], w_ref[...],
                              preferred_element_type=jnp.float32)

        @pl.when(k == last_k)
        def _():
            o_ref[...] = _epilogue(o_ref[...], b_ref, m_ref).astype(o_ref.dtype)

    if training:
        def kernel(x_ref, w_ref, b_ref, m_ref, o_ref):
            _body(x_ref, w_ref, b_ref, m_ref, o_ref)
    else:
        def kernel(x_ref, w_ref, b_ref, o_ref):
            _body(x_ref, w_ref, b_ref, None, o_ref)
    return kernel


# --------------------------------- wrapper ---------------------------------- #

_FULL_W_RESIDENT_BYTES = 4 * 1024 * 1024   # keep-the-whole-weight-in-VMEM cutoff


def linear_dropout_relu(x, w_t, b, *, training=False, dropout_key=None,
                        p_drop=0.5, operand_dtype=jnp.bfloat16,
                        blk_m=None, blk_n=None, blk_k=None):
    """y = relu(dropout(x @ w_t + b)).   x: (B, K), w_t: (K, N), b: (N,)."""
    B, K = x.shape
    K2, N = w_t.shape
    assert K == K2, (K, K2)

    itemsize = jnp.dtype(operand_dtype).itemsize
    n_lane = _round_up(N, 128)
    k_lane = _round_up(K, 128)
    m_sub = _round_up(B, 16)                 # bf16 packs 16 sublanes / vreg
    w_resident = k_lane * n_lane * itemsize <= _FULL_W_RESIDENT_BYTES

    # Tile sizes.  Fully VMEM-resident weight when it fits (single N/K tile:
    # W is DMA'd exactly once and the kernel is a pure X stream); otherwise
    # lane-dense N tiles and wide K tiles so per-grid-step overhead amortizes.
    if blk_n is None:
        blk_n = n_lane if w_resident else min(n_lane, 256)
    if blk_k is None:
        blk_k = k_lane if w_resident else min(k_lane, 2048)
    if blk_m is None:
        # Aim for >=2 M tiles when possible so megacore (v7x) has work on both cores.
        blk_m = min(256, max(16, _round_up(_cdiv(m_sub, 2), 16)))
        blk_m = min(blk_m, m_sub)

    Mp = _round_up(B, blk_m)
    Np = _round_up(N, blk_n)
    Kp = _round_up(K, blk_k)
    grid = (Mp // blk_m, Np // blk_n, Kp // blk_k)
    single_k = grid[2] == 1

    # Operands: cast to bf16 for the MXU; pad only when actually unaligned
    # (zero padding is an exact no-op for the matmul).
    x_op = x if x.dtype == operand_dtype else x.astype(operand_dtype)
    if x_op.shape != (Mp, Kp):
        x_op = jnp.zeros((Mp, Kp), operand_dtype).at[:B, :K].set(x_op)
    w_op = w_t if w_t.dtype == operand_dtype else w_t.astype(operand_dtype)
    if w_op.shape != (Kp, Np):
        w_op = jnp.zeros((Kp, Np), operand_dtype).at[:K, :N].set(w_op)
    b_op = b.astype(jnp.float32).reshape(1, N)
    if b_op.shape != (1, Np):
        b_op = jnp.zeros((1, Np), jnp.float32).at[:, :N].set(b_op)

    in_specs = [
        pl.BlockSpec((blk_m, blk_k), lambda i, j, k: (i, k)),   # activations
        pl.BlockSpec((blk_k, blk_n), lambda i, j, k: (k, j)),   # weight
        pl.BlockSpec((1, blk_n), lambda i, j, k: (0, j)),       # bias (resident)
    ]
    operands = [x_op, w_op, b_op]

    if training:
        if dropout_key is None:
            dropout_key = jax.random.PRNGKey(0)
        keep_p = 1.0 - p_drop
        # Keep-mask pre-scaled by 1/keep_p, generated once in the wrapper so the
        # kernel only needs portable primitives.
        # TODO(synk): a TPU-only build could use pltpu.prng_random_bits in the
        # epilogue instead and drop this (Mp, Np) mask stream entirely.
        mask = (jax.random.bernoulli(dropout_key, keep_p, (Mp, Np))
                .astype(jnp.float32) * (1.0 / keep_p))
        in_specs.append(pl.BlockSpec((blk_m, blk_n), lambda i, j, k: (i, j)))
        operands.append(mask)

    # Rough VMEM footprint (double-buffered inputs + resident f32 output block).
    est = (2 * (blk_m * blk_k + blk_k * blk_n) * itemsize
           + 2 * blk_m * blk_n * 4 + 2 * blk_n * 4)
    if training:
        est += 2 * blk_m * blk_n * 4
    vmem_limit = None
    if est > 12 * 1024 * 1024:
        vmem_limit = min(max(int(est * 1.5), 32 * 1024 * 1024), 48 * 1024 * 1024)

    kernel = _make_kernel(training=training, single_k=single_k)
    out = pl.pallas_call(
        kernel,
        out_shape=jax.ShapeDtypeStruct((Mp, Np), jnp.float32),
        grid=grid,
        in_specs=in_specs,
        out_specs=pl.BlockSpec((blk_m, blk_n), lambda i, j, k: (i, j)),
        compiler_params=pltpu.CompilerParams(
            dimension_semantics=("parallel", "parallel", "arbitrary"),
            vmem_limit_bytes=vmem_limit),
    )(*operands)

    if (Mp, Np) != (B, N):
        out = out[:B, :N]
    if out.dtype != x.dtype:
        out = out.astype(x.dtype)
    return out


# ------------------------- parameters & forward pass ------------------------ #

def init_dann_backbone_params(key, n_input, n_hidden=256):
    """nn.Linear(n_input, n_hidden) params.

    'weight' keeps the torch (n_hidden, n_input) f32 layout; 'weight_t' is the
    pre-transposed, pre-cast bf16 (n_input, n_hidden) copy the kernel consumes,
    built once here so no per-call transpose/cast pass over HBM is needed.
    """
    kw, kb = jax.random.split(key)
    bound = 1.0 / math.sqrt(n_input)
    weight = jax.random.uniform(kw, (n_hidden, n_input), jnp.float32, -bound, bound)
    bias = jax.random.uniform(kb, (n_hidden,), jnp.float32, -bound, bound)
    return {
        'weight': weight,
        'weight_t': weight.T.astype(jnp.bfloat16),
        'bias': bias,
        'n_hidden': n_hidden,
    }


def dann_backbone_forward(params, x, *, training=False, dropout_key=None):
    """DaNNBackbone.forward: x.view(B, -1) -> Linear -> Dropout(0.5) -> ReLU."""
    B = x.shape[0]
    x2 = x.reshape(B, -1)                    # x.view(x.size(0), -1)
    return linear_dropout_relu(x2, params['weight_t'], params['bias'],
                               training=training, dropout_key=dropout_key)


# ----------------------------------- main ----------------------------------- #

if __name__ == "__main__":
    key = jax.random.PRNGKey(0)
    pkey, xkey, dkey = jax.random.split(key, 3)

    B, C, H, W = 2, 4, 16, 16                # small shapes; n_input = C*H*W
    n_input = C * H * W                      # 1024
    n_hidden = 256                           # module default feature dim

    params = init_dann_backbone_params(pkey, n_input, n_hidden)
    x = jax.random.normal(xkey, (B, C, H, W), jnp.float32)

    # ---- eval mode (dropout = identity), checked against a plain-JAX ref ----
    fwd_eval = jax.jit(lambda inp: dann_backbone_forward(params, inp, training=False))
    feats = jax.block_until_ready(fwd_eval(x))
    assert feats.shape == (B, n_hidden), feats.shape
    assert bool(jnp.all(jnp.isfinite(feats)))

    x2 = x.reshape(B, -1)
    xb = x2.astype(jnp.bfloat16).astype(jnp.float32)
    wb = params['weight_t'].astype(jnp.float32)
    ref = jnp.maximum(
        jnp.dot(xb, wb, precision=jax.lax.Precision.HIGHEST) + params['bias'], 0.0)
    assert jnp.allclose(feats, ref, atol=2e-2, rtol=2e-2), \
        float(jnp.max(jnp.abs(feats - ref)))

    # ---- multi-K-tile path (exercises the accumulate-into-output K loop) ----
    feats_tiled = jax.block_until_ready(
        linear_dropout_relu(x2, params['weight_t'], params['bias'],
                            training=False, blk_k=256))
    assert jnp.allclose(feats_tiled, feats, atol=1e-3, rtol=1e-3)

    # ---- training mode (fused dropout, p = 0.5) ----
    fwd_train = jax.jit(
        lambda inp, k: dann_backbone_forward(params, inp, training=True,
                                             dropout_key=k))
    feats_tr = jax.block_until_ready(fwd_train(x, dkey))
    assert feats_tr.shape == (B, n_hidden), feats_tr.shape
    assert bool(jnp.all(jnp.isfinite(feats_tr)))
    # Dropout can only zero entries; kept entries are scaled by 1/(1-p) = 2.
    assert int(jnp.sum(feats_tr == 0)) >= int(jnp.sum(feats == 0))
    diff = jnp.where(feats_tr > 0, feats_tr - 2.0 * feats, 0.0)
    assert float(jnp.max(jnp.abs(diff))) < 2e-2

    print("KERNEL_OK")
</pallas_src>

<mosaic_0001>
module attributes {stable_mosaic.version = 11 : i64} {
  func.func @kernel(%arg0: i32, %arg1: i32, %arg2: i32, %arg3: memref<16x1024xbf16, #tpu.memory_space<vmem>>, %arg4: memref<1024x256xbf16, #tpu.memory_space<vmem>>, %arg5: memref<1x256xf32, #tpu.memory_space<vmem>>, %arg6: memref<16x256xf32, #tpu.memory_space<vmem>>) attributes {dimension_semantics = [#tpu.dimension_semantics<parallel>, #tpu.dimension_semantics<parallel>, #tpu.dimension_semantics<arbitrary>], iteration_bounds = array<i64: 1, 1, 1>, scalar_prefetch = 0 : i64, scratch_operands = 0 : i64, tpu.core_type = #tpu.core_type<tc>, window_params = [{transform_indices = @transform_0, window_bounds = array<i64: 16, 1024>}, {transform_indices = @transform_1, window_bounds = array<i64: 1024, 256>}, {transform_indices = @transform_2, window_bounds = array<i64: 1, 256>}, {transform_indices = @transform_3, window_bounds = array<i64: 16, 256>}]} {
    %c0 = arith.constant 0 : index
    %c0_0 = arith.constant 0 : index
    %0 = vector.load %arg3[%c0, %c0_0] : memref<16x1024xbf16, #tpu.memory_space<vmem>>, vector<16x1024xbf16>
    %c0_1 = arith.constant 0 : index
    %c0_2 = arith.constant 0 : index
    %1 = vector.load %arg4[%c0_1, %c0_2] : memref<1024x256xbf16, #tpu.memory_space<vmem>>, vector<1024x256xbf16>
    %cst = arith.constant dense<0.000000e+00> : vector<16x256xf32>
    %2 = tpu.matmul %0, %1, %cst {dimension_numbers = #tpu.dot_dimension_numbers<[1], [0], [0], [1], [0, 0, 1, 1], [], []>} : vector<16x1024xbf16>, vector<1024x256xbf16>, vector<16x256xf32> -> vector<16x256xf32>
    %c0_3 = arith.constant 0 : index
    %c0_4 = arith.constant 0 : index
    %3 = vector.load %arg5[%c0_3, %c0_4] : memref<1x256xf32, #tpu.memory_space<vmem>>, vector<1x256xf32>
    %4 = vector.broadcast %3 : vector<1x256xf32> to vector<16x256xf32>
    %5 = arith.addf %2, %4 : vector<16x256xf32>
    %cst_5 = arith.constant 0.000000e+00 : f32
    %6 = vector.broadcast %cst_5 : f32 to vector<16x256xf32>
    %7 = arith.maximumf %5, %6 : vector<16x256xf32>
    %c0_6 = arith.constant 0 : index
    %c0_7 = arith.constant 0 : index
    %8 = vector.load %arg6[%c0_6, %c0_7] : memref<16x256xf32, #tpu.memory_space<vmem>>, vector<16x256xf32>
    tpu.vector_store %arg6[%c0_6, %c0_7], %7 {strides = array<i32>} : memref<16x256xf32, #tpu.memory_space<vmem>>, vector<16x256xf32>,
    return
  }
  func.func @transform_0(%arg0: i32, %arg1: i32, %arg2: i32) -> (i32, i32) {
    %c0_i32 = arith.constant 0 : i32
    return %arg0, %arg2 : i32, i32
  }
  func.func @transform_1(%arg0: i32, %arg1: i32, %arg2: i32) -> (i32, i32) {
    %c0_i32 = arith.constant 0 : i32
    return %arg2, %arg1 : i32, i32
  }
  func.func @transform_2(%arg0: i32, %arg1: i32, %arg2: i32) -> (i32, i32) {
    %c0_i32 = arith.constant 0 : i32
    %c0_i32_0 = arith.constant 0 : i32
    return %c0_i32, %arg1 : i32, i32
  }
  func.func @transform_3(%arg0: i32, %arg1: i32, %arg2: i32) -> (i32, i32) {
    %c0_i32 = arith.constant 0 : i32
    return %arg0, %arg1 : i32, i32
  }
}

</mosaic_0001>

<bundles_post_ra>
// kernel: _lambda_.1
= control target key start
LH: loop header
LB: loop body
LE: loop exit
PB: predicated region body
PF: predicated region fallthrough
CT: control target
= control target key end

     0   :  { %8 = vsyncpa [#allocation3], 0  ;;  %s1394_s12 = smov [#allocation2]   ;;  %s1475_s0 = inlined_call_operand.vmem [shape: bf16[16,1024], index: 0, kind: input, shape index: {}]   ;;  %s1476_s1 = inlined_call_operand.hbm [shape: bf16[1024,256], index: 1, kind: input, shape index: {}]   ;;  %s1477_s2 = inlined_call_operand.vmem [shape: f32[1,256], index: 2, kind: input, shape index: {}]   ;;  %s1478_s3 = inlined_call_operand.vmem [shape: f32[16,256], index: 3, kind: output, shape index: {}]  }
   0x1   :  { %s16_s13 = sshll.u32 %s1394_s12, 4  ;;  %s17_s13 = int_to_ptr.vmem [resolvable:$true] %s16_s13 }
   0x2   :  { %s1380_s14 = scalar_lea.vmem %s17_s13, 16384  ;;  %p1385_p1 = scmp.lt.s32.totalorder %s17_s13, %s17_s13 }
   0x3   :  { %p1381_p0 = scmp.ne.s32.totalorder %s17_s13, %s1380_s14  ;;  %p1386_p2 = scmp.lt.s32.totalorder %s1380_s14, %s1380_s14 }
   0x5   :  { %p1387_p3 = por %p1386_p2, %p1385_p1 }
   0x7   :  { %p1388_p4 = pnand %p1387_p3, %p1381_p0 }
   0x9   :  { %1391 = shalt.err (!%p1388_p4)
}
   0xa   :  { %s1395_s15 = smov 128   ;;  %s1396_s16 = smov 8  }
   0xb   :  { %22 = dma.hbm_to_vmem [thread:$0]  %s1476_s1, 16384, %s17_s13, [#allocation3], %s1395_s15, %s1395_s15, %s1396_s16  }
   0xc   :  { %1392 = dma.done.wait [#allocation3], 16384  }
   0xd   :  { %1393 = vsyncadd [#allocation3], 4294950912  ;;  %v1180_v0 = vld [vmem:[#allocation2 + $0x74] ss:$8 sps:$4 sm:$0xff]   ;;  %v1184_v2 = vld [vmem:[#allocation2 + $0x70] ss:$8 sps:$4 sm:$0xff]  }
   0xe   :  { %v1182_v1 = vld [vmem:[#allocation2 + $0x174] ss:$8 sps:$4 sm:$0xff]   ;;  %856 = vmatprep.subr.bf16.mxu0 %v1180_v0  ;;  %v1185_v3 = vld [vmem:[#allocation2 + $0x170] ss:$8 sps:$4 sm:$0xff]   ;;  %v1186_v4 = vld [vmem:[#allocation2 + $0x64] ss:$8 sps:$4 sm:$0xff]  }
   0xf   :  { %899 = vmatprep.subr.bf16.mxu1 %v1182_v1  ;;  %857 = vmatpush1.bf16.msra.mxu0 %v1184_v2  ;;  %v1188_v5 = vld [vmem:[#allocation2 + $0x164] ss:$8 sps:$4 sm:$0xff]   ;;  %v1190_v6 = vld [vmem:[#allocation2 + $0x60] ss:$8 sps:$4 sm:$0xff]   ;;  %v1192_v8 = vld [vmem:[#allocation2 + $0x54] ss:$8 sps:$4 sm:$0xff]  }
  0x10   :  { %900 = vmatpush1.bf16.msra.mxu1 %v1185_v3  ;;  %858 = vmatprep.subr.bf16.mxu0 %v1186_v4  ;;  %v1191_v7 = vld [vmem:[#allocation2 + $0x160] ss:$8 sps:$4 sm:$0xff]   ;;  %v1194_v9 = vld [vmem:[#allocation2 + $0x154] ss:$8 sps:$4 sm:$0xff]   ;;  %v1196_v10 = vld [vmem:[#allocation2 + $0x50] ss:$8 sps:$4 sm:$0xff]  }
  0x11   :  { %901 = vmatprep.subr.bf16.mxu1 %v1188_v5  ;;  %v1197_v11 = vld [vmem:[#allocation2 + $0x150] ss:$8 sps:$4 sm:$0xff]   ;;  %v1198_v12 = vld [vmem:[#allocation2 + $0x44] ss:$8 sps:$4 sm:$0xff]   ;;  %v1202_v14 = vld [vmem:[#allocation2 + $0x40] ss:$8 sps:$4 sm:$0xff]  }
  0x12   :  { %v1200_v13 = vld [vmem:[#allocation2 + $0x144] ss:$8 sps:$4 sm:$0xff]   ;;  %v1203_v15 = vld [vmem:[#allocation2 + $0x140] ss:$8 sps:$4 sm:$0xff]   ;;  %v1204_v16 = vld [vmem:[#allocation2 + $0x34] ss:$8 sps:$4 sm:$0xff]  }
  0x13   :  { %859 = vmatpush1.bf16.msra.mxu0 %v1190_v6  ;;  %v1206_v17 = vld [vmem:[#allocation2 + $0x134] ss:$8 sps:$4 sm:$0xff]   ;;  %v1208_v18 = vld [vmem:[#allocation2 + $0x30] ss:$8 sps:$4 sm:$0xff]   ;;  %v1210_v20 = vld [vmem:[#allocation2 + $0x24] ss:$8 sps:$4 sm:$0xff]  }
  0x14   :  { %902 = vmatpush1.bf16.msra.mxu1 %v1191_v7  ;;  %860 = vmatprep.subr.bf16.mxu0 %v1192_v8  ;;  %v1209_v19 = vld [vmem:[#allocation2 + $0x130] ss:$8 sps:$4 sm:$0xff]   ;;  %v1212_v21 = vld [vmem:[#allocation2 + $0x124] ss:$8 sps:$4 sm:$0xff]   ;;  %v1214_v22 = vld [vmem:[#allocation2 + $0x20] ss:$8 sps:$4 sm:$0xff]  }
  0x15   :  { %903 = vmatprep.subr.bf16.mxu1 %v1194_v9  ;;  %v1215_v23 = vld [vmem:[#allocation2 + $0x120] ss:$8 sps:$4 sm:$0xff]   ;;  %v1216_v24 = vld [vmem:[#allocation2 + $0x14] ss:$8 sps:$4 sm:$0xff]   ;;  %v1220_v26 = vld [vmem:[#allocation2 + $0x10] ss:$8 sps:$4 sm:$0xff]  }
  0x16   :  { %v1218_v25 = vld [vmem:[#allocation2 + $0x114] ss:$8 sps:$4 sm:$0xff]   ;;  %v1221_v27 = vld [vmem:[#allocation2 + $0x110] ss:$8 sps:$4 sm:$0xff]   ;;  %v1222_v28 = vld [vmem:[#allocation2 + $0x4] ss:$8 sps:$4 sm:$0xff]  }
  0x17   :  { %861 = vmatpush1.bf16.msra.mxu0 %v1196_v10  ;;  %v1224_v29 = vld [vmem:[#allocation2 + $0x104] ss:$8 sps:$4 sm:$0xff]   ;;  %v1226_v30 = vld [vmem:[#allocation2] ss:$8 sps:$4 sm:$0xff]   ;;  %v1228_v32 = vld [vmem:[#allocation2 + $0xf4] ss:$8 sps:$4 sm:$0xff]  }
  0x18   :  { %904 = vmatpush1.bf16.msra.mxu1 %v1197_v11  ;;  %862 = vmatprep.subr.bf16.mxu0 %v1198_v12  ;;  %v1227_v31 = vld [vmem:[#allocation2 + $0x100] ss:$8 sps:$4 sm:$0xff]   ;;  %v1230_v33 = vld [vmem:[#allocation2 + $0x1f4] ss:$8 sps:$4 sm:$0xff]   ;;  %v1232_v34 = vld [vmem:[#allocation2 + $0xf0] ss:$8 sps:$4 sm:$0xff]  }
  0x19   :  { %905 = vmatprep.subr.bf16.mxu1 %v1200_v13  ;;  %v1233_v35 = vld [vmem:[#allocation2 + $0x1f0] ss:$8 sps:$4 sm:$0xff]   ;;  %v1234_v36 = vld [vmem:[#allocation2 + $0xe4] ss:$8 sps:$4 sm:$0xff]   ;;  %v1238_v38 = vld [vmem:[#allocation2 + $0xe0] ss:$8 sps:$4 sm:$0xff]  }
  0x1a   :  { %v1236_v37 = vld [vmem:[#allocation2 + $0x1e4] ss:$8 sps:$4 sm:$0xff]   ;;  %v1239_v39 = vld [vmem:[#allocation2 + $0x1e0] ss:$8 sps:$4 sm:$0xff]   ;;  %v1240_v40 = vld [vmem:[#allocation2 + $0xd4] ss:$8 sps:$4 sm:$0xff]  }
  0x1b   :  { %863 = vmatpush1.bf16.msra.mxu0 %v1202_v14  ;;  %v1242_v41 = vld [vmem:[#allocation2 + $0x1d4] ss:$8 sps:$4 sm:$0xff]   ;;  %v1244_v42 = vld [vmem:[#allocation2 + $0xd0] ss:$8 sps:$4 sm:$0xff]   ;;  %v1246_v44 = vld [vmem:[#allocation2 + $0xc4] ss:$8 sps:$4 sm:$0xff]  }
  0x1c   :  { %906 = vmatpush1.bf16.msra.mxu1 %v1203_v15  ;;  %864 = vmatprep.subr.bf16.mxu0 %v1204_v16  ;;  %v1245_v43 = vld [vmem:[#allocation2 + $0x1d0] ss:$8 sps:$4 sm:$0xff]   ;;  %v1248_v45 = vld [vmem:[#allocation2 + $0x1c4] ss:$8 sps:$4 sm:$0xff]   ;;  %v1250_v46 = vld [vmem:[#allocation2 + $0xc0] ss:$8 sps:$4 sm:$0xff]  }
  0x1d   :  { %907 = vmatprep.subr.bf16.mxu1 %v1206_v17  ;;  %v1251_v47 = vld [vmem:[#allocation2 + $0x1c0] ss:$8 sps:$4 sm:$0xff]   ;;  %v1252_v52 = vld [vmem:[#allocation2 + $0xb4] ss:$8 sps:$4 sm:$0xff]   ;;  %v1256_v56 = vld [vmem:[#allocation2 + $0xb0] ss:$8 sps:$4 sm:$0xff]  }
  0x1e   :  { %v28_v48 = vld [vmem:[%s1475_s0] sm:$0xff]  ;;  %v29_v50 = vld [vmem:[%s1475_s0 + $0x8] sm:$0xff]  ;;  %v1254_v54 = vld [vmem:[#allocation2 + $0x1b4] ss:$8 sps:$4 sm:$0xff]  }
  0x1f   :  { %865 = vmatpush1.bf16.msra.mxu0 %v1208_v18  ;;  %v32_v49 = vld [vmem:[%s1475_s0 + $0x20] sm:$0xff]  ;;  %v33_v51 = vld [vmem:[%s1475_s0 + $0x28] sm:$0xff]  ;;  %v1257_v57 = vld [vmem:[#allocation2 + $0x1b0] ss:$8 sps:$4 sm:$0xff]  }
  0x20   :  { %908 = vmatpush1.bf16.msra.mxu1 %v1209_v19  ;;  %866 = vmatprep.subr.bf16.mxu0 %v1210_v20  ;;  %v1042_v53 = vcombine.high %v28_v48, %v32_v49  ;;  %v1044_v55 = vcombine.high %v29_v50, %v33_v51  ;;  %v1258_v58 = vld [vmem:[#allocation2 + $0xa4] ss:$8 sps:$4 sm:$0xff]   ;;  %v1262_v60 = vld [vmem:[#allocation2 + $0xa0] ss:$8 sps:$4 sm:$0xff]   ;;  %v1264_v62 = vld [vmem:[#allocation2 + $0x94] ss:$8 sps:$4 sm:$0xff]   ;;  %v1041_v8 = vcombine.low %v28_v48, %v32_v49 }
  0x21   :  { %909 = vmatprep.subr.bf16.mxu1 %v1212_v21  ;;  %v1260_v59 = vld [vmem:[#allocation2 + $0x1a4] ss:$8 sps:$4 sm:$0xff]   ;;  %v1263_v61 = vld [vmem:[#allocation2 + $0x1a0] ss:$8 sps:$4 sm:$0xff]   ;;  %v1266_v63 = vld [vmem:[#allocation2 + $0x194] ss:$8 sps:$4 sm:$0xff]   ;;  %v1043_v9 = vcombine.low %v29_v50, %v33_v51 }
  0x22   :  { %888 = vmatprep.mubr.bf16.mxu0 %v1042_v53  ;;  %931 = vmatprep.mubr.bf16.mxu1 %v1044_v55  ;;  %v1268_v0 = vld [vmem:[#allocation2 + $0x90] ss:$8 sps:$4 sm:$0xff]   ;;  %v1270_v2 = vld [vmem:[#allocation2 + $0x84] ss:$8 sps:$4 sm:$0xff]   ;;  %v1274_v4 = vld [vmem:[#allocation2 + $0x80] ss:$8 sps:$4 sm:$0xff]  }
  0x23   :  { %867 = vmatpush1.bf16.msra.mxu0 %v1214_v22  ;;  %v1269_v1 = vld [vmem:[#allocation2 + $0x190] ss:$8 sps:$4 sm:$0xff]   ;;  %v1272_v3 = vld [vmem:[#allocation2 + $0x184] ss:$8 sps:$4 sm:$0xff]   ;;  %v1275_v5 = vld [vmem:[#allocation2 + $0x180] ss:$8 sps:$4 sm:$0xff]  }
  0x24   :  { %910 = vmatpush1.bf16.msra.mxu1 %v1215_v23  ;;  %868 = vmatprep.subr.bf16.mxu0 %v1216_v24  ;;  %v1278_v6 = vld [vmem:[#allocation2 + $0x274] ss:$8 sps:$4 sm:$0xff]   ;;  %v1276_v10 = vld [vmem:[#allocation2 + $0x270] ss:$8 sps:$4 sm:$0xff]   ;;  %v1284_v12 = vld [vmem:[#allocation2 + $0x264] ss:$8 sps:$4 sm:$0xff]  }
  0x25   :  { %911 = vmatprep.subr.bf16.mxu1 %v1218_v25  ;;  %v1281_v7 = vld [vmem:[#allocation2 + $0x374] ss:$8 sps:$4 sm:$0xff]   ;;  %v1279_v11 = vld [vmem:[#allocation2 + $0x370] ss:$8 sps:$4 sm:$0xff]   ;;  %v1287_v13 = vld [vmem:[#allocation2 + $0x364] ss:$8 sps:$4 sm:$0xff]  }
  0x26   :  { %v1282_v14 = vld [vmem:[#allocation2 + $0x260] ss:$8 sps:$4 sm:$0xff]   ;;  %v1290_v16 = vld [vmem:[#allocation2 + $0x254] ss:$8 sps:$4 sm:$0xff]   ;;  %v1288_v18 = vld [vmem:[#allocation2 + $0x250] ss:$8 sps:$4 sm:$0xff]  }
  0x27   :  { %869 = vmatpush1.bf16.msra.mxu0 %v1220_v26  ;;  %v1285_v15 = vld [vmem:[#allocation2 + $0x360] ss:$8 sps:$4 sm:$0xff]   ;;  %v1293_v17 = vld [vmem:[#allocation2 + $0x354] ss:$8 sps:$4 sm:$0xff]   ;;  %v1291_v19 = vld [vmem:[#allocation2 + $0x350] ss:$8 sps:$4 sm:$0xff]  }
  0x28   :  { %912 = vmatpush1.bf16.msra.mxu1 %v1221_v27  ;;  %870 = vmatprep.subr.bf16.mxu0 %v1222_v28  ;;  %v1296_v20 = vld [vmem:[#allocation2 + $0x244] ss:$8 sps:$4 sm:$0xff]   ;;  %v1294_v22 = vld [vmem:[#allocation2 + $0x240] ss:$8 sps:$4 sm:$0xff]   ;;  %v1302_v24 = vld [vmem:[#allocation2 + $0x234] ss:$8 sps:$4 sm:$0xff]  }
  0x29   :  { %913 = vmatprep.subr.bf16.mxu1 %v1224_v29  ;;  %v1299_v21 = vld [vmem:[#allocation2 + $0x344] ss:$8 sps:$4 sm:$0xff]   ;;  %v1297_v23 = vld [vmem:[#allocation2 + $0x340] ss:$8 sps:$4 sm:$0xff]   ;;  %v1305_v25 = vld [vmem:[#allocation2 + $0x334] ss:$8 sps:$4 sm:$0xff]  }
  0x2a   :  { %v1300_v26 = vld [vmem:[#allocation2 + $0x230] ss:$8 sps:$4 sm:$0xff]   ;;  %v1308_v28 = vld [vmem:[#allocation2 + $0x224] ss:$8 sps:$4 sm:$0xff]   ;;  %v1333_v53 = vld [vmem:[#allocation2 + $0x3e0] ss:$8 sps:$4 sm:$0xff]  }
  0x2b   :  { %871 = vmatpush1.bf16.msra.mxu0 %v1226_v30  ;;  %v1303_v27 = vld [vmem:[#allocation2 + $0x330] ss:$8 sps:$4 sm:$0xff]   ;;  %v1311_v29 = vld [vmem:[#allocation2 + $0x324] ss:$8 sps:$4 sm:$0xff]   ;;  %v1306_v30 = vld [vmem:[#allocation2 + $0x220] ss:$8 sps:$4 sm:$0xff]  }
  0x2c   :  { %914 = vmatpush1.bf16.msra.mxu1 %v1227_v31  ;;  %872 = vmatprep.subr.bf16.mxu0 %v1228_v32  ;;  %v1309_v31 = vld [vmem:[#allocation2 + $0x320] ss:$8 sps:$4 sm:$0xff]   ;;  %v1314_v32 = vld [vmem:[#allocation2 + $0x214] ss:$8 sps:$4 sm:$0xff]   ;;  %v1324_v48 = vld [vmem:[#allocation2 + $0x2f0] ss:$8 sps:$4 sm:$0xff]  }
  0x2d   :  { %915 = vmatprep.subr.bf16.mxu1 %v1230_v33  ;;  %v1317_v33 = vld [vmem:[#allocation2 + $0x314] ss:$8 sps:$4 sm:$0xff]   ;;  %v1327_v49 = vld [vmem:[#allocation2 + $0x3f0] ss:$8 sps:$4 sm:$0xff]   ;;  %v1332_v50 = vld [vmem:[#allocation2 + $0x2e4] ss:$8 sps:$4 sm:$0xff]  }
  0x2e   :  { %v1335_v51 = vld [vmem:[#allocation2 + $0x3e4] ss:$8 sps:$4 sm:$0xff]   ;;  %v1341_v55 = vld [vmem:[#allocation2 + $0x3d4] ss:$8 sps:$4 sm:$0xff]  }
  0x2f   :  { %873 = vmatpush2.bf16.msra.mxu0 %v1232_v34  ;;  %v1435_v34 = vld [vmem:[%s1475_s0 + $0x10] sm:$0xff] }
  0x30   :  { %916 = vmatpush2.bf16.msra.mxu1 %v1233_v35  ;;  %874 = vmatprep.subr.bf16.mxu0 %v1234_v36  ;;  %v1440_v35 = vld [vmem:[%s1475_s0 + $0x30] sm:$0xff]  ;;  %v1445_v36 = vld [vmem:[%s1475_s0 + $0x18] sm:$0xff] }
  0x31   :  { %917 = vmatprep.subr.bf16.mxu1 %v1236_v37  ;;  %v1450_v37 = vld [vmem:[%s1475_s0 + $0x38] sm:$0xff] }
  0x33   :  { %875 = vmatpush2.bf16.msra.mxu0 %v1238_v38  ;;  %v1312_v38 = vld [vmem:[#allocation2 + $0x210] ss:$8 sps:$4 sm:$0xff]  }
  0x34   :  { %918 = vmatpush2.bf16.msra.mxu1 %v1239_v39  ;;  %876 = vmatprep.subr.bf16.mxu0 %v1240_v40  ;;  %v1315_v39 = vld [vmem:[#allocation2 + $0x310] ss:$8 sps:$4 sm:$0xff]   ;;  %v1046_v40 = vcombine.high %v1435_v34, %v1440_v35 }
  0x35   :  { %919 = vmatprep.subr.bf16.mxu1 %v1242_v41  ;;  %v1320_v41 = vld [vmem:[#allocation2 + $0x204] ss:$8 sps:$4 sm:$0xff]  }
  0x37   :  { %877 = vmatpush2.bf16.msra.mxu0 %v1244_v42  ;;  %v1323_v42 = vld [vmem:[#allocation2 + $0x304] ss:$8 sps:$4 sm:$0xff]  }
  0x38   :  { %920 = vmatpush2.bf16.msra.mxu1 %v1245_v43  ;;  %878 = vmatprep.subr.bf16.mxu0 %v1246_v44  ;;  %v1048_v43 = vcombine.high %v1445_v36, %v1450_v37  ;;  %v1318_v44 = vld [vmem:[#allocation2 + $0x200] ss:$8 sps:$4 sm:$0xff]  }
  0x39   :  { %921 = vmatprep.subr.bf16.mxu1 %v1248_v45  ;;  %v1321_v45 = vld [vmem:[#allocation2 + $0x300] ss:$8 sps:$4 sm:$0xff]  }
  0x3b   :  { %879 = vmatpush2.bf16.msra.mxu0 %v1250_v46  ;;  %v1326_v46 = vld [vmem:[#allocation2 + $0x2f4] ss:$8 sps:$4 sm:$0xff]  }
  0x3c   :  { %922 = vmatpush2.bf16.msra.mxu1 %v1251_v47  ;;  %880 = vmatprep.subr.bf16.mxu0 %v1252_v52  ;;  %v1329_v47 = vld [vmem:[#allocation2 + $0x3f4] ss:$8 sps:$4 sm:$0xff]   ;;  %v1330_v52 = vld [vmem:[#allocation2 + $0x2e0] ss:$8 sps:$4 sm:$0xff]  }
  0x3d   :  { %923 = vmatprep.subr.bf16.mxu1 %v1254_v54  ;;  %v1338_v54 = vld [vmem:[#allocation2 + $0x2d4] ss:$8 sps:$4 sm:$0xff]  }
  0x3f   :  { %881 = vmatpush2.bf16.msra.mxu0 %v1256_v56  ;;  %v1336_v56 = vld [vmem:[#allocation2 + $0x2d0] ss:$8 sps:$4 sm:$0xff]  }
  0x40   :  { %924 = vmatpush2.bf16.msra.mxu1 %v1257_v57  ;;  %882 = vmatprep.subr.bf16.mxu0 %v1258_v58  ;;  %v1339_v57 = vld [vmem:[#allocation2 + $0x3d0] ss:$8 sps:$4 sm:$0xff]   ;;  %v1344_v58 = vld [vmem:[#allocation2 + $0x2c4] ss:$8 sps:$4 sm:$0xff]  }
  0x41   :  { %925 = vmatprep.subr.bf16.mxu1 %v1260_v59  ;;  %v1347_v59 = vld [vmem:[#allocation2 + $0x3c4] ss:$8 sps:$4 sm:$0xff]  }
  0x43   :  { %883 = vmatpush2.bf16.msra.mxu0 %v1262_v60  ;;  %v1342_v60 = vld [vmem:[#allocation2 + $0x2c0] ss:$8 sps:$4 sm:$0xff]  }
  0x44   :  { %926 = vmatpush2.bf16.msra.mxu1 %v1263_v61  ;;  %884 = vmatprep.subr.bf16.mxu0 %v1264_v62  ;;  %v1345_v61 = vld [vmem:[#allocation2 + $0x3c0] ss:$8 sps:$4 sm:$0xff]   ;;  %v1350_v62 = vld [vmem:[#allocation2 + $0x2b4] ss:$8 sps:$4 sm:$0xff]  }
  0x45   :  { %927 = vmatprep.subr.bf16.mxu1 %v1266_v63  ;;  %v1353_v63 = vld [vmem:[#allocation2 + $0x3b4] ss:$8 sps:$4 sm:$0xff]  }
  0x47   :  { %885 = vmatpush2.bf16.msra.mxu0 %v1268_v0  ;;  %v1348_v0 = vld [vmem:[#allocation2 + $0x2b0] ss:$8 sps:$4 sm:$0xff]  }
  0x48   :  { %928 = vmatpush2.bf16.msra.mxu1 %v1269_v1  ;;  %886 = vmatprep.subr.bf16.mxu0 %v1270_v2  ;;  %v1351_v1 = vld [vmem:[#allocation2 + $0x3b0] ss:$8 sps:$4 sm:$0xff]   ;;  %v1356_v2 = vld [vmem:[#allocation2 + $0x2a4] ss:$8 sps:$4 sm:$0xff]  }
  0x49   :  { %929 = vmatprep.subr.bf16.mxu1 %v1272_v3  ;;  %v1359_v3 = vld [vmem:[#allocation2 + $0x3a4] ss:$8 sps:$4 sm:$0xff]  }
  0x4b   :  { %887 = vmatpush2.bf16.msra.mxu0 %v1274_v4  ;;  %v1354_v4 = vld [vmem:[#allocation2 + $0x2a0] ss:$8 sps:$4 sm:$0xff]  }
  0x4c   :  { %930 = vmatpush2.bf16.msra.mxu1 %v1275_v5  ;;  %942 = vmatprep.subr.bf16.mxu0 %v1278_v6  ;;  %v1357_v5 = vld [vmem:[#allocation2 + $0x3a0] ss:$8 sps:$4 sm:$0xff]   ;;  %v1362_v6 = vld [vmem:[#allocation2 + $0x294] ss:$8 sps:$4 sm:$0xff]  }
  0x4d   :  { %985 = vmatprep.subr.bf16.mxu1 %v1281_v7  ;;  %v1365_v7 = vld [vmem:[#allocation2 + $0x394] ss:$8 sps:$4 sm:$0xff]  }
  0x4e   :  { %889 = vmatmul.mubr.bf16.vlgmr.msra.gmra.mxu0 %v1041_v8  ;;  %v1360_v8 = vld [vmem:[#allocation2 + $0x290] ss:$8 sps:$4 sm:$0xff]  }
  0x4f   :  { %932 = vmatmul.mubr.bf16.vlgmr.msra.gmra.mxu1 %v1043_v9  ;;  %943 = vmatpush1.bf16.msra.mxu0 %v1276_v10  ;;  %v1363_v9 = vld [vmem:[#allocation2 + $0x390] ss:$8 sps:$4 sm:$0xff]   ;;  %v1368_v10 = vld [vmem:[#allocation2 + $0x284] ss:$8 sps:$4 sm:$0xff]  }
  0x50   :  { %986 = vmatpush1.bf16.msra.mxu1 %v1279_v11  ;;  %944 = vmatprep.subr.bf16.mxu0 %v1284_v12  ;;  %v1371_v11 = vld [vmem:[#allocation2 + $0x384] ss:$8 sps:$4 sm:$0xff]   ;;  %v1366_v12 = vld [vmem:[#allocation2 + $0x280] ss:$8 sps:$4 sm:$0xff]  }
  0x51   :  { %987 = vmatprep.subr.bf16.mxu1 %v1287_v13  ;;  %974 = vmatprep.mubr.bf16.mxu0 %v1046_v40  ;;  %v1369_v13 = vld [vmem:[#allocation2 + $0x380] ss:$8 sps:$4 sm:$0xff]  }
  0x52   :  { %1017 = vmatprep.mubr.bf16.mxu1 %v1048_v43 }
  0x53   :  { %945 = vmatpush1.bf16.msra.mxu0 %v1282_v14  ;;  %v1045_v14 = vcombine.low %v1435_v34, %v1440_v35 }
  0x54   :  { %988 = vmatpush1.bf16.msra.mxu1 %v1285_v15  ;;  %946 = vmatprep.subr.bf16.mxu0 %v1290_v16  ;;  %v1047_v15 = vcombine.low %v1445_v36, %v1450_v37  ;;  %v166_v16 = vlaneseq }
  0x55   :  { %989 = vmatprep.subr.bf16.mxu1 %v1293_v17 }
  0x56   :  { %v167_v17 = vshrl.u32 %v166_v16, 7 }
  0x57   :  { %947 = vmatpush1.bf16.msra.mxu0 %v1288_v18 }
  0x58   :  { %990 = vmatpush1.bf16.msra.mxu1 %v1291_v19  ;;  %948 = vmatprep.subr.bf16.mxu0 %v1296_v20  ;;  %v168_v20 = vsub.s32 0, %v167_v17 }
  0x59   :  { %991 = vmatprep.subr.bf16.mxu1 %v1299_v21  ;;  %v164_v21 = vld [vmem:[%s1477_s2] sm:$0x3] }
  0x5b   :  { %949 = vmatpush1.bf16.msra.mxu0 %v1294_v22  ;;  %v172_v22 = vsub.s32 1, %v167_v17 }
  0x5c   :  { %992 = vmatpush1.bf16.msra.mxu1 %v1297_v23  ;;  %950 = vmatprep.subr.bf16.mxu0 %v1302_v24 }
  0x5d   :  { %993 = vmatprep.subr.bf16.mxu1 %v1305_v25  ;;  %v169_v25 = vrot.slane %v164_v21, %v168_v20 }
  0x5f   :  { %951 = vmatpush1.bf16.msra.mxu0 %v1300_v26  ;;  %v173_v26 = vrot.slane %v164_v21, %v172_v22 }
  0x60   :  { %994 = vmatpush1.bf16.msra.mxu1 %v1303_v27  ;;  %952 = vmatprep.subr.bf16.mxu0 %v1308_v28 }
  0x61   :  { %995 = vmatprep.subr.bf16.mxu1 %v1311_v29 }
  0x63   :  { %953 = vmatpush1.bf16.msra.mxu0 %v1306_v30 }
  0x64   :  { %996 = vmatpush1.bf16.msra.mxu1 %v1309_v31  ;;  %954 = vmatprep.subr.bf16.mxu0 %v1314_v32 }
  0x65   :  { %997 = vmatprep.subr.bf16.mxu1 %v1317_v33 }
  0x67   :  { %955 = vmatpush1.bf16.msra.mxu0 %v1312_v38 }
  0x68   :  { %998 = vmatpush1.bf16.msra.mxu1 %v1315_v39  ;;  %956 = vmatprep.subr.bf16.mxu0 %v1320_v41 }
  0x69   :  { %999 = vmatprep.subr.bf16.mxu1 %v1323_v42 }
  0x6b   :  { %957 = vmatpush1.bf16.msra.mxu0 %v1318_v44 }
  0x6c   :  { %1000 = vmatpush1.bf16.msra.mxu1 %v1321_v45  ;;  %958 = vmatprep.subr.bf16.mxu0 %v1326_v46 }
  0x6d   :  { %1001 = vmatprep.subr.bf16.mxu1 %v1329_v47 }
  0x6f   :  { %959 = vmatpush2.bf16.msra.mxu0 %v1324_v48 }
  0x70   :  { %1002 = vmatpush2.bf16.msra.mxu1 %v1327_v49  ;;  %960 = vmatprep.subr.bf16.mxu0 %v1332_v50 }
  0x71   :  { %1003 = vmatprep.subr.bf16.mxu1 %v1335_v51 }
  0x73   :  { %961 = vmatpush2.bf16.msra.mxu0 %v1330_v52 }
  0x74   :  { %1004 = vmatpush2.bf16.msra.mxu1 %v1333_v53  ;;  %962 = vmatprep.subr.bf16.mxu0 %v1338_v54 }
  0x75   :  { %1005 = vmatprep.subr.bf16.mxu1 %v1341_v55 }
  0x77   :  { %963 = vmatpush2.bf16.msra.mxu0 %v1336_v56 }
  0x78   :  { %1006 = vmatpush2.bf16.msra.mxu1 %v1339_v57  ;;  %964 = vmatprep.subr.bf16.mxu0 %v1344_v58 }
  0x79   :  { %1007 = vmatprep.subr.bf16.mxu1 %v1347_v59 }
  0x7b   :  { %965 = vmatpush2.bf16.msra.mxu0 %v1342_v60 }
  0x7c   :  { %1008 = vmatpush2.bf16.msra.mxu1 %v1345_v61  ;;  %966 = vmatprep.subr.bf16.mxu0 %v1350_v62 }
  0x7d   :  { %1009 = vmatprep.subr.bf16.mxu1 %v1353_v63 }
  0x7f   :  { %967 = vmatpush2.bf16.msra.mxu0 %v1348_v0 }
  0x80   :  { %1010 = vmatpush2.bf16.msra.mxu1 %v1351_v1  ;;  %968 = vmatprep.subr.bf16.mxu0 %v1356_v2 }
  0x81   :  { %1011 = vmatprep.subr.bf16.mxu1 %v1359_v3 }
  0x83   :  { %969 = vmatpush2.bf16.msra.mxu0 %v1354_v4 }
  0x84   :  { %1012 = vmatpush2.bf16.msra.mxu1 %v1357_v5  ;;  %970 = vmatprep.subr.bf16.mxu0 %v1362_v6 }
  0x85   :  { %1013 = vmatprep.subr.bf16.mxu1 %v1365_v7 }
  0x87   :  { %971 = vmatpush2.bf16.msra.mxu0 %v1360_v8 }
  0x88   :  { %1014 = vmatpush2.bf16.msra.mxu1 %v1363_v9  ;;  %972 = vmatprep.subr.bf16.mxu0 %v1368_v10 }
  0x89   :  { %1015 = vmatprep.subr.bf16.mxu1 %v1371_v11 }
  0x8b   :  { %973 = vmatpush2.bf16.msra.mxu0 %v1366_v12 }
  0x8c   :  { %1016 = vmatpush2.bf16.msra.mxu1 %v1369_v13 }
  0x8e   :  { %975 = vmatmul.mubr.bf16.vlgmr.msra.gmra.mxu0 %v1045_v14 }
  0x8f   :  { %1018 = vmatmul.mubr.bf16.vlgmr.msra.gmra.mxu1 %v1047_v15 }
 0x10e   :  { %v890_v18 = vpop.f32.mrf.mxu0 }
 0x10f   :  { %v933_v19 = vpop.f32.mrf.mxu1  ;;  %v891_v29 = vadd.f32 %v890_v18, %v169_v25 }
 0x110   :  { %v892_v23 = vpop.f32.mrf.mxu0 }
 0x111   :  { %v935_v24 = vpop.f32.mrf.mxu1  ;;  %v893_v30 = vadd.f32 %v892_v23, %v173_v26  ;;  %v934_v33 = vadd.f32 %v933_v19, %v891_v29 }
 0x112   :  { %v894_v27 = vpop.f32.mrf.mxu0 }
 0x113   :  { %v937_v28 = vpop.f32.mrf.mxu1  ;;  %v895_v34 = vadd.f32 %v894_v27, %v169_v25  ;;  %v936_v37 = vadd.f32 %v935_v24, %v893_v30 }
 0x114   :  { %v896_v31 = vpop.f32.mrf.mxu0 }
 0x115   :  { %v939_v32 = vpop.f32.mrf.mxu1  ;;  %v897_v38 = vadd.f32 %v896_v31, %v173_v26  ;;  %v938_v42 = vadd.f32 %v937_v28, %v895_v34 }
 0x117   :  { %v940_v47 = vadd.f32 %v939_v32, %v897_v38 }
 0x14e   :  { %v976_v35 = vpop.f32.mrf.mxu0 }
 0x14f   :  { %v1019_v36 = vpop.f32.mrf.mxu1  ;;  %v977_v39 = vadd.f32 %v976_v35, %v934_v33 }
 0x150   :  { %v978_v40 = vpop.f32.mrf.mxu0 }
 0x151   :  { %v1021_v41 = vpop.f32.mrf.mxu1  ;;  %v1020_v43 = vadd.f32 %v1019_v36, %v977_v39  ;;  %v979_v44 = vadd.f32 %v978_v40, %v936_v37 }
 0x152   :  { %v980_v45 = vpop.f32.mrf.mxu0 }
 0x153   :  { %v1023_v46 = vpop.f32.mrf.mxu1  ;;  %v1028_v48 = vmax.f32 %v1020_v43, 0.0  ;;  %v1022_v49 = vadd.f32 %v1021_v41, %v979_v44  ;;  %v981_v50 = vadd.f32 %v980_v45, %v938_v42 }
 0x154   :  { %v982_v51 = vpop.f32.mrf.mxu0 }
 0x155   :  { %1032 = vst [vmem:[%s1478_s3] sm:$0xff] %v1028_v48  ;;  %v1029_v52 = vmax.f32 %v1022_v49, 0.0  ;;  %v1024_v53 = vadd.f32 %v1023_v46, %v981_v50  ;;  %v983_v54 = vadd.f32 %v982_v51, %v940_v47  ;;  %v1025_v55 = vpop.f32.mrf.mxu1 }
 0x157   :  { %1033 = vst [vmem:[%s1478_s3 + $0x8] sm:$0xff] %v1029_v52  ;;  %v1030_v56 = vmax.f32 %v1024_v53, 0.0  ;;  %v1026_v57 = vadd.f32 %v1025_v55, %v983_v54 }
 0x159   :  { %1034 = vst [vmem:[%s1478_s3 + $0x10] sm:$0xff] %v1030_v56  ;;  %v1031_v58 = vmax.f32 %v1026_v57, 0.0 }
 0x15b   :  { %1035 = vst [vmem:[%s1478_s3 + $0x18] sm:$0xff] %v1031_v58 }
 0x15c   :  { %1040 = vsyncpa [#allocation3], 1 }

</bundles_post_ra>
